<compile_context>
chip_gen: v7x
topology: tpu7x:2x2x1
jax: 0.10.0
libtpu: 0.0.40
codegen_flags: <defaults>
</compile_context>

<pallas_src>
import functools

import numpy as np
import jax
import jax.numpy as jnp
from jax import lax
from jax.experimental import pallas as pl
from jax.experimental.pallas import tpu as pltpu


def _round_up(x, m):
    return (x + m - 1) // m * m


POS_DIM = 32       # positional-encoding width (stands in for input_dim=128)
BACKBONE_C1 = 32
BACKBONE_C2 = 64
HIDDEN = 64        # stands in for hidden_dim=256
HP = 128           # hidden padded to a full 128-lane tile
EDGE_KIN = 2 * POS_DIM + 3
TME = 256          # edge rows per block


# ----------------------------------------------------------------------------
# Pallas kernel: fused  act(A @ W + b)  -> bf16   (single K step; K is small)
# ----------------------------------------------------------------------------
def _lin_kernel(a_ref, w_ref, b_ref, o_ref, *, act):
    out = jnp.dot(a_ref[...].astype(jnp.bfloat16), w_ref[...],
                  preferred_element_type=jnp.float32) + b_ref[...]
    if act == "relu":
        out = jnp.maximum(out, 0.0)
    o_ref[...] = out.astype(o_ref.dtype)


def pallas_linear(a, w_bf, b_f32, act="none", out_dtype=jnp.bfloat16):
    """act(a @ w + b).  Weights are pre-cast bf16, K/N kept exact (full-dim
    blocks), activation cast to bf16 inside the kernel -> no host padding/cast
    passes.  Output is bf16 so the next layer reads half the bytes."""
    M, K = a.shape
    K2, N = w_bf.shape
    assert K == K2
    # TODO(synk): add a K-tiled accumulation path for very large K (not needed
    # for this model's layer widths).
    M8 = _round_up(M, 8)
    if M8 != M:
        a = jnp.zeros((M8, K), a.dtype).at[:M].set(a)
    # >=2 M blocks when possible so the "parallel" axis can use both v7x cores.
    if M8 % 16 == 0 and M8 // 2 <= 512:
        tm = M8 // 2
    elif M8 <= 512:
        tm = M8
    else:
        tm = next(t for t in (512, 256, 128, 64, 32, 16, 8) if M8 % t == 0)

    out = pl.pallas_call(
        functools.partial(_lin_kernel, act=act),
        out_shape=jax.ShapeDtypeStruct((M8, N), out_dtype),
        grid_spec=pltpu.PrefetchScalarGridSpec(
            num_scalar_prefetch=0,
            grid=(M8 // tm,),
            in_specs=[
                pl.BlockSpec((tm, K), lambda i: (i, 0)),
                pl.BlockSpec((K, N), lambda i: (0, 0)),
                pl.BlockSpec((1, N), lambda i: (0, 0)),
            ],
            out_specs=pl.BlockSpec((tm, N), lambda i: (i, 0)),
        ),
        compiler_params=pltpu.CompilerParams(dimension_semantics=("parallel",)),
    )(a, w_bf, b_f32)
    return out[:M] if M8 != M else out


# ----------------------------------------------------------------------------
# Parameter init (deterministic, synthetic) + one-time padded/bf16 weights
# ----------------------------------------------------------------------------
def init_params(key):
    keys = jax.random.split(key, 6)

    def w(k, shape, scale=0.05):
        return jax.random.normal(k, shape, jnp.float32) * scale

    return {
        # backbone (ResNet stand-in: two patchify convs, relu)
        "conv1_w": w(keys[0], (3 * 4 * 4, BACKBONE_C1)),
        "conv1_b": jnp.zeros((BACKBONE_C1,), jnp.float32),
        "conv2_w": w(keys[1], (BACKBONE_C1 * 2 * 2, BACKBONE_C2)),
        "conv2_b": jnp.zeros((BACKBONE_C2,), jnp.float32),
        # corner head (HeatCorner stand-in)
        "corner_w1": w(keys[2], (BACKBONE_C2 + POS_DIM, HIDDEN)),
        "corner_b1": jnp.zeros((HIDDEN,), jnp.float32),
        "corner_w2": w(keys[3], (HIDDEN, 1)),
        "corner_b2": jnp.zeros((1,), jnp.float32),
        # edge head (HeatEdge stand-in): 3 two-class heads (s1, hb, rel)
        "edge_w1": w(keys[4], (EDGE_KIN, HIDDEN)),
        "edge_b1": jnp.zeros((HIDDEN,), jnp.float32),
        "edge_w2": w(keys[5], (HIDDEN, 6)),
        "edge_b2": jnp.zeros((6,), jnp.float32),
    }


def prepare_params(p):
    """Pad/cast/transpose static weights ONCE; reused by every forward pass."""
    prep = {}
    # backbone convs: bf16 weights, f32 bias rows; K/N kept exact (full blocks).
    prep["conv1_w"] = p["conv1_w"].astype(jnp.bfloat16)
    prep["conv1_b"] = p["conv1_b"].reshape(1, -1)
    prep["conv2_w"] = p["conv2_w"].astype(jnp.bfloat16)
    prep["conv2_b"] = p["conv2_b"].reshape(1, -1)

    # ---- corner head (transposed layout, hidden padded 64 -> HP=128) ----
    C = BACKBONE_C2
    w1 = p["corner_w1"]                                   # (C + POS_DIM, HIDDEN)
    prep["corner_w1_img_T"] = (jnp.zeros((HP, C), jnp.bfloat16)
                               .at[:HIDDEN].set(w1[:C].T.astype(jnp.bfloat16)))
    prep["corner_w1_pix_T"] = (jnp.zeros((HP, POS_DIM), jnp.bfloat16)
                               .at[:HIDDEN].set(w1[C:].T.astype(jnp.bfloat16)))
    prep["corner_b1_col"] = (jnp.zeros((HP, 1), jnp.float32)
                             .at[:HIDDEN, 0].set(p["corner_b1"]))
    prep["corner_w2_T"] = (jnp.zeros((8, HP), jnp.bfloat16)
                           .at[0, :HIDDEN].set(p["corner_w2"][:, 0]
                                               .astype(jnp.bfloat16)))
    prep["corner_b2"] = p["corner_b2"].reshape(1, 1)

    # ---- edge head (loop-invariant / per-iteration split, hidden -> HP) ----
    KPOS = 2 * POS_DIM
    ew1 = p["edge_w1"]
    prep["edge_w1_pos"] = (jnp.zeros((KPOS, HP), jnp.bfloat16)
                           .at[:, :HIDDEN].set(ew1[:KPOS].astype(jnp.bfloat16)))
    prep["edge_b1"] = (jnp.zeros((1, HP), jnp.float32)
                       .at[0, :HIDDEN].set(p["edge_b1"]))
    prep["edge_w1_gt"] = (jnp.zeros((8, HP), jnp.float32)
                          .at[:3, :HIDDEN].set(ew1[KPOS:]))       # rows for gt=0,1,2
    ew2, eb2 = p["edge_w2"], p["edge_b2"]
    w2e = jnp.zeros((HP, 128), jnp.float32).at[:HIDDEN, :6].set(ew2)
    # extra columns hold logit differences so softmax probs fall out of the
    # same matmul (softmax([a,b])[1] == sigmoid(b-a)).
    w2e = w2e.at[:HIDDEN, 6].set(ew2[:, 3] - ew2[:, 2])   # hb  positive-class
    w2e = w2e.at[:HIDDEN, 7].set(ew2[:, 1] - ew2[:, 0])   # s1  positive-class
    w2e = w2e.at[:HIDDEN, 8].set(ew2[:, 5] - ew2[:, 4])   # rel positive-class
    prep["edge_w2"] = w2e.astype(jnp.bfloat16)
    b2e = jnp.zeros((1, 128), jnp.float32).at[0, :6].set(eb2)
    b2e = b2e.at[0, 6].set(eb2[3] - eb2[2])
    b2e = b2e.at[0, 7].set(eb2[1] - eb2[0])
    b2e = b2e.at[0, 8].set(eb2[5] - eb2[4])
    prep["edge_b2"] = b2e
    return prep


# ----------------------------------------------------------------------------
# Positional features / backbone
# ----------------------------------------------------------------------------
def get_pixel_features(image_size, dim=POS_DIM):
    ys, xs = jnp.meshgrid(jnp.arange(image_size), jnp.arange(image_size),
                          indexing="ij")
    pixels = jnp.stack([xs.reshape(-1), ys.reshape(-1)], axis=-1)  # (HW, 2) (x,y)
    half = dim // 2
    freqs = jnp.exp(-jnp.log(10000.0) * jnp.arange(0, half, 2) / half)

    def enc(v):
        ang = v.astype(jnp.float32)[..., None] * freqs
        return jnp.concatenate([jnp.sin(ang), jnp.cos(ang)], axis=-1)

    feats = jnp.concatenate([enc(ys), enc(xs)], axis=-1)  # (H, W, dim)
    return pixels, feats


def _patchify(x, k):
    B, H, W, C = x.shape
    Ho, Wo = H // k, W // k
    x = x.reshape(B, Ho, k, Wo, k, C).transpose(0, 1, 3, 2, 4, 5)
    return x.reshape(B, Ho, Wo, k * k * C)


def backbone(prep, image_nchw):
    x = jnp.transpose(image_nchw, (0, 2, 3, 1))          # NCHW -> NHWC
    # TODO(synk): fuse the k x k patch gather into the conv pallas_call via a
    # BlockSpec index_map over the 4-D NHWC tensor (strided DMA) instead of
    # this host reshape/transpose pass.
    p1 = _patchify(x, 4)
    B, H1, W1, K1 = p1.shape
    f1 = pallas_linear(p1.reshape(-1, K1), prep["conv1_w"], prep["conv1_b"],
                       act="relu").reshape(B, H1, W1, -1)
    p2 = _patchify(f1, 2)
    _, H2, W2, K2 = p2.shape
    f2 = pallas_linear(p2.reshape(-1, K2), prep["conv2_w"], prep["conv2_b"],
                       act="relu").reshape(B, H2, W2, -1)
    feat_mask = jnp.zeros((B, H2, W2), jnp.bool_)
    return f2, feat_mask, [f1, f2]


# ----------------------------------------------------------------------------
# Fused corner head, TRANSPOSED layout: hidden (HP) on sublanes, pixels (T) on
# lanes.  Grid = (B, Hf); each block handles one backbone row (scale*W pixels).
# The nearest-neighbour upsample is a precomputed 0/1 bf16 matrix (constant
# index_map), so no iota/mod/div and no upsampled tensor in HBM.  The output
# is a lane-dense (8, T) probability block (row 0 useful) -> 16x less write
# than the previous (T, 128) slab.
# ----------------------------------------------------------------------------
def _corner_kernel(img_ref, pix_ref, sel_ref, w1i_ref, w1p_ref, b1_ref,
                   w2_ref, b2_ref, o_ref):
    img_h = jnp.dot(w1i_ref[...], img_ref[...],
                    preferred_element_type=jnp.float32)           # (HP, Wfp)
    up_h = jnp.dot(img_h.astype(jnp.bfloat16), sel_ref[...],
                   preferred_element_type=jnp.float32)            # (HP, T)
    pix_h = jnp.dot(w1p_ref[...], pix_ref[...],
                    preferred_element_type=jnp.float32)           # (HP, T)
    h = jnp.maximum(up_h + pix_h + b1_ref[...], 0.0)
    logits = jnp.dot(w2_ref[...], h.astype(jnp.bfloat16),
                     preferred_element_type=jnp.float32) + b2_ref[...]   # (8, T)
    o_ref[...] = pl.reciprocal(1.0 + jnp.exp(-logits), approx=True)      # sigmoid


def corner_model(prep, image_feats, pixel_features):
    B, Hf, Wf, C = image_feats.shape
    H, W, D = pixel_features.shape
    scale = H // Hf
    T = scale * W
    Wfp = _round_up(Wf, 8)

    # backbone features transposed once (tiny tensor): (B, Hf, C, Wfp) bf16
    imgT = (jnp.zeros((B, Hf, C, Wfp), jnp.bfloat16)
            .at[:, :, :, :Wf].set(jnp.transpose(image_feats, (0, 1, 3, 2))
                                  .astype(jnp.bfloat16)))
    # static positional features, transposed per backbone row: (Hf, D, T) bf16
    pixT = (pixel_features.reshape(Hf, scale, W, D)
            .transpose(0, 3, 1, 2).reshape(Hf, D, T).astype(jnp.bfloat16))
    # static 0/1 nearest-neighbour upsample matrix, built once on host
    cols = (np.arange(T) % W) // scale
    selT_np = np.zeros((Wfp, T), np.float32)
    selT_np[cols, np.arange(T)] = 1.0
    selT = jnp.asarray(selT_np, jnp.bfloat16)

    out = pl.pallas_call(
        _corner_kernel,
        out_shape=jax.ShapeDtypeStruct((B, Hf, 8, T), jnp.float32),
        grid_spec=pltpu.PrefetchScalarGridSpec(
            num_scalar_prefetch=0,
            grid=(B, Hf),
            in_specs=[
                pl.BlockSpec((None, None, C, Wfp), lambda b, h: (b, h, 0, 0)),
                pl.BlockSpec((None, D, T), lambda b, h: (h, 0, 0)),
                pl.BlockSpec((Wfp, T), lambda b, h: (0, 0)),
                pl.BlockSpec((HP, C), lambda b, h: (0, 0)),
                pl.BlockSpec((HP, D), lambda b, h: (0, 0)),
                pl.BlockSpec((HP, 1), lambda b, h: (0, 0)),
                pl.BlockSpec((8, HP), lambda b, h: (0, 0)),
                pl.BlockSpec((1, 1), lambda b, h: (0, 0)),
            ],
            out_specs=pl.BlockSpec((None, None, 8, T), lambda b, h: (b, h, 0, 0)),
        ),
        compiler_params=pltpu.CompilerParams(
            dimension_semantics=("parallel", "parallel")),
    )(imgT, pixT, selT, prep["corner_w1_img_T"], prep["corner_w1_pix_T"],
      prep["corner_b1_col"], prep["corner_w2_T"], prep["corner_b2"])
    # row 0 of each (8, T) block holds the probabilities, in pixel row-major order
    return out[:, :, 0, :].reshape(B, H * W)


# ----------------------------------------------------------------------------
# Edge head.  Loop-invariant part (positional features @ W1_pos + b1) is one
# pallas_call before the host loop; each of the 3 host-synced iterations runs
# only the tiny kernel below (gt-row add + relu + W2 matmul + folded softmax).
# ----------------------------------------------------------------------------
def _edge_base_kernel(f_ref, w1_ref, b1_ref, o_ref):
    o_ref[...] = jnp.dot(f_ref[...], w1_ref[...],
                         preferred_element_type=jnp.float32) + b1_ref[...]


def edge_hidden_base(prep, feats_base):
    Ep, KPOS = feats_base.shape
    return pl.pallas_call(
        _edge_base_kernel,
        out_shape=jax.ShapeDtypeStruct((Ep, HP), jnp.float32),
        grid_spec=pltpu.PrefetchScalarGridSpec(
            num_scalar_prefetch=0,
            grid=(Ep // TME,),
            in_specs=[
                pl.BlockSpec((TME, KPOS), lambda i: (i, 0)),
                pl.BlockSpec((KPOS, HP), lambda i: (0, 0)),
                pl.BlockSpec((1, HP), lambda i: (0, 0)),
            ],
            out_specs=pl.BlockSpec((TME, HP), lambda i: (i, 0)),
        ),
        compiler_params=pltpu.CompilerParams(dimension_semantics=("parallel",)),
    )(feats_base, prep["edge_w1_pos"], prep["edge_b1"])


def _edge_iter_kernel(gt_ref, hb_ref, w1gt_ref, w2_ref, b2_ref, o_ref):
    g = gt_ref[...]                                           # (TME, 1) int32
    r0 = w1gt_ref[0:1, :]
    r1 = w1gt_ref[1:2, :]
    r2 = w1gt_ref[2:3, :]
    gt_h = jnp.where(g == 0, r0, jnp.where(g == 1, r1, r2))   # (TME, HP) f32
    h = jnp.maximum(hb_ref[...] + gt_h, 0.0)
    logits = jnp.dot(h.astype(jnp.bfloat16), w2_ref[...],
                     preferred_element_type=jnp.float32) + b2_ref[...]  # (TME,128)
    # lanes 6..8 carry logit differences -> write softmax probabilities there
    lane = lax.broadcasted_iota(jnp.int32, logits.shape, 1)
    probs = pl.reciprocal(1.0 + jnp.exp(-logits), approx=True)
    o_ref[...] = jnp.where((lane >= 6) & (lane < 9), probs, logits)


def edge_iteration(prep, h_base, gt_col):
    Ep = h_base.shape[0]
    return pl.pallas_call(
        _edge_iter_kernel,
        out_shape=jax.ShapeDtypeStruct((Ep, 128), jnp.float32),
        grid_spec=pltpu.PrefetchScalarGridSpec(
            num_scalar_prefetch=0,
            grid=(Ep // TME,),
            in_specs=[
                pl.BlockSpec((TME, 1), lambda i: (i, 0)),
                pl.BlockSpec((TME, HP), lambda i: (i, 0)),
                pl.BlockSpec((8, HP), lambda i: (0, 0)),
                pl.BlockSpec((HP, 128), lambda i: (0, 0)),
                pl.BlockSpec((1, 128), lambda i: (0, 0)),
            ],
            out_specs=pl.BlockSpec((TME, 128), lambda i: (i, 0)),
        ),
        compiler_params=pltpu.CompilerParams(dimension_semantics=("parallel",)),
    )(gt_col, h_base, prep["edge_w1_gt"], prep["edge_w2"], prep["edge_b2"])


def build_edge_feats_base(pixel_features, edge_coords):
    """Gather the two corner positional features once; reused by all 3
    iterations (the gt contribution is added per-iteration in-kernel)."""
    H, W, D = pixel_features.shape
    c = jnp.asarray(edge_coords)                             # (E, 4) x1,y1,x2,y2
    pf = pixel_features.reshape(H * W, D)
    f1 = pf[c[:, 1] * W + c[:, 0]]
    f2 = pf[c[:, 3] * W + c[:, 2]]
    E = int(c.shape[0])
    Ep = _round_up(max(E, 1), TME)
    feats = jnp.zeros((Ep, 2 * D), jnp.bfloat16).at[:E].set(
        jnp.concatenate([f1, f2], axis=1).astype(jnp.bfloat16))
    return feats


# ----------------------------------------------------------------------------
# Host-side (numpy) post-processing — data-dependent shapes
# ----------------------------------------------------------------------------
def corner_nms(corners, confs, dist=5):
    # TODO(synk): simplified greedy Chebyshev NMS stand-in for reference corner_nms.
    order = np.argsort(-confs)
    keep = []
    suppressed = np.zeros(len(confs), bool)
    for i in order:
        if suppressed[i]:
            continue
        keep.append(i)
        d = np.abs(corners - corners[i]).max(axis=1)
        suppressed |= d <= dist
    keep = np.array(keep, dtype=np.int64)
    return corners[keep], confs[keep]


def get_infer_edge_pairs(corners, confs):
    n = len(corners)
    ids = [(i, j) for i in range(n) for j in range(i + 1, n)]
    edge_ids = np.array(ids, dtype=np.int64).reshape(-1, 2)
    if len(ids):
        edge_coords = np.concatenate(
            [corners[edge_ids[:, 0]], corners[edge_ids[:, 1]]], axis=1)
    else:
        edge_coords = np.zeros((0, 4), np.int64)
    edge_mask = np.zeros((1, len(ids)), bool)
    return corners, confs, edge_coords, edge_mask, edge_ids


def postprocess_preds(corners, confs, pos_edges):
    if len(pos_edges) == 0:
        return corners, confs, pos_edges
    used = np.unique(pos_edges.reshape(-1))
    remap = -np.ones(len(corners), np.int64)
    remap[used] = np.arange(len(used))
    return corners[used], confs[used], remap[pos_edges]


# ----------------------------------------------------------------------------
# HEAT forward
# ----------------------------------------------------------------------------
def heat_forward(prep, image):
    image_size = image.shape[-1]
    image_feats, feat_mask, all_image_feats = backbone(prep, image)
    pixels, pixel_features = get_pixel_features(image_size)

    c_outputs = corner_model(prep, image_feats, pixel_features)   # (B, H*W)
    c_outputs_np = np.asarray(c_outputs)                          # single D2H sync

    pixels_np = np.asarray(pixels)
    pos_indices = np.where(c_outputs_np[0] >= 0.01)
    pred_corners = pixels_np[pos_indices]
    pred_confs = c_outputs_np[0][pos_indices]
    pred_corners, pred_confs = corner_nms(pred_corners, pred_confs)
    pred_corners, pred_confs, edge_coords, edge_mask, edge_ids = \
        get_infer_edge_pairs(pred_corners, pred_confs)

    E = edge_ids.shape[0]
    all_pos_ids = set()
    all_edge_confs = {}
    if E > 0:
        feats_base = build_edge_feats_base(pixel_features, edge_coords)
        Ep = feats_base.shape[0]
        h_base = edge_hidden_base(prep, feats_base)      # loop-invariant, done once
        gt_values = np.full((1, E), 2, dtype=np.int64)   # tt == 0 init
        gt_pad = np.full((Ep, 1), 2, dtype=np.int32)
        num_filtered = 0                                 # simplified: all selected
        selected_np = np.arange(E)
        s2_mask_np = np.zeros((1, E), bool)
        for tt in range(3):
            gt_pad[:E, 0] = gt_values[0]
            out = edge_iteration(prep, h_base, jnp.asarray(gt_pad))
            out_np = np.asarray(out)[:E]                 # 1 launch + 1 D2H per iter
            s2_preds_hb_np = out_np[:, 6]                # softmax prob folded in-kernel
            if tt != 2:
                pos_edge_ids = np.where(s2_preds_hb_np >= 0.9)[0]
                neg_edge_ids = np.where(s2_preds_hb_np <= 0.01)[0]
                for pos_id in pos_edge_ids:
                    actual_id = int(selected_np[pos_id])
                    if gt_values[0, actual_id] != 2:
                        continue
                    all_pos_ids.add(actual_id)
                    all_edge_confs[actual_id] = float(s2_preds_hb_np[pos_id])
                    gt_values[0, actual_id] = 1
                for neg_id in neg_edge_ids:
                    actual_id = int(selected_np[neg_id])
                    if gt_values[0, actual_id] != 2:
                        continue
                    gt_values[0, actual_id] = 0
                num_to_pred = int((gt_values == 2).sum())
                if num_to_pred <= num_filtered:
                    break
            else:
                pos_edge_ids = np.where(s2_preds_hb_np >= 0.5)[0]
                for pos_id in pos_edge_ids:
                    actual_id = int(selected_np[pos_id])
                    if bool(s2_mask_np[0, pos_id]) or gt_values[0, actual_id] != 2:
                        continue
                    all_pos_ids.add(actual_id)
                    all_edge_confs[actual_id] = float(s2_preds_hb_np[pos_id])

    pos_edge_ids = list(all_pos_ids)
    pos_edges = (edge_ids[pos_edge_ids] if len(pos_edge_ids)
                 else np.zeros((0, 2), np.int64))
    pred_corners, pred_confs, pos_edges = postprocess_preds(
        pred_corners, pred_confs, pos_edges)
    pred_data = {"corners": pred_corners, "edges": pos_edges}
    return pred_data, c_outputs


if __name__ == "__main__":
    key = jax.random.PRNGKey(0)
    k_param, k_img = jax.random.split(key)
    params = init_params(k_param)
    prep = prepare_params(params)            # pad/cast/transpose weights once
    image = jax.random.normal(k_img, (2, 3, 32, 32), jnp.float32)  # NCHW (PyTorch)

    pred_data, c_outputs = heat_forward(prep, image)
    jax.block_until_ready(c_outputs)
    assert pred_data["corners"].ndim == 2 and pred_data["corners"].shape[1] == 2
    assert pred_data["edges"].ndim == 2
    print("KERNEL_OK")
</pallas_src>

<mosaic_0001>
module attributes {stable_mosaic.version = 11 : i64} {
  func.func @_lin_kernel(%arg0: i32, %arg1: memref<64x48xf32, #tpu.memory_space<vmem>>, %arg2: memref<48x32xbf16, #tpu.memory_space<vmem>>, %arg3: memref<1x32xf32, #tpu.memory_space<vmem>>, %arg4: memref<64x32xbf16, #tpu.memory_space<vmem>>) attributes {dimension_semantics = [#tpu.dimension_semantics<parallel>], iteration_bounds = array<i64: 2>, scalar_prefetch = 0 : i64, scratch_operands = 0 : i64, tpu.core_type = #tpu.core_type<tc>, window_params = [{transform_indices = @transform_0, window_bounds = array<i64: 64, 48>}, {pipeline_mode = #tpu.pipeline_mode<synchronous>, transform_indices = @transform_1, window_bounds = array<i64: 48, 32>}, {pipeline_mode = #tpu.pipeline_mode<synchronous>, transform_indices = @transform_2, window_bounds = array<i64: 1, 32>}, {transform_indices = @transform_3, window_bounds = array<i64: 64, 32>}]} {
    %c0 = arith.constant 0 : index
    %c0_0 = arith.constant 0 : index
    %0 = vector.load %arg1[%c0, %c0_0] : memref<64x48xf32, #tpu.memory_space<vmem>>, vector<64x48xf32>
    %1 = arith.truncf %0 : vector<64x48xf32> to vector<64x48xbf16>
    %c0_1 = arith.constant 0 : index
    %c0_2 = arith.constant 0 : index
    %2 = vector.load %arg2[%c0_1, %c0_2] : memref<48x32xbf16, #tpu.memory_space<vmem>>, vector<48x32xbf16>
    %cst = arith.constant dense<0.000000e+00> : vector<64x32xf32>
    %3 = tpu.matmul %1, %2, %cst {dimension_numbers = #tpu.dot_dimension_numbers<[1], [0], [0], [1], [0, 0, 1, 1], [], []>} : vector<64x48xbf16>, vector<48x32xbf16>, vector<64x32xf32> -> vector<64x32xf32>
    %c0_3 = arith.constant 0 : index
    %c0_4 = arith.constant 0 : index
    %4 = vector.load %arg3[%c0_3, %c0_4] : memref<1x32xf32, #tpu.memory_space<vmem>>, vector<1x32xf32>
    %5 = vector.broadcast %4 : vector<1x32xf32> to vector<64x32xf32>
    %6 = arith.addf %3, %5 : vector<64x32xf32>
    %cst_5 = arith.constant 0.000000e+00 : f32
    %7 = vector.broadcast %cst_5 : f32 to vector<64x32xf32>
    %8 = arith.maximumf %6, %7 : vector<64x32xf32>
    %9 = arith.truncf %8 : vector<64x32xf32> to vector<64x32xbf16>
    %c0_6 = arith.constant 0 : index
    %c0_7 = arith.constant 0 : index
    %10 = vector.load %arg4[%c0_6, %c0_7] : memref<64x32xbf16, #tpu.memory_space<vmem>>, vector<64x32xbf16>
    tpu.vector_store %arg4[%c0_6, %c0_7], %9 {strides = array<i32>} : memref<64x32xbf16, #tpu.memory_space<vmem>>, vector<64x32xbf16>,
    return
  }
  func.func @transform_0(%arg0: i32) -> (i32, i32) {
    %c0_i32 = arith.constant 0 : i32
    %c0_i32_0 = arith.constant 0 : i32
    return %arg0, %c0_i32 : i32, i32
  }
  func.func @transform_1(%arg0: i32) -> (i32, i32) {
    %c0_i32 = arith.constant 0 : i32
    %c0_i32_0 = arith.constant 0 : i32
    %c0_i32_1 = arith.constant 0 : i32
    return %c0_i32, %c0_i32_0 : i32, i32
  }
  func.func @transform_2(%arg0: i32) -> (i32, i32) {
    %c0_i32 = arith.constant 0 : i32
    %c0_i32_0 = arith.constant 0 : i32
    %c0_i32_1 = arith.constant 0 : i32
    return %c0_i32, %c0_i32_0 : i32, i32
  }
  func.func @transform_3(%arg0: i32) -> (i32, i32) {
    %c0_i32 = arith.constant 0 : i32
    %c0_i32_0 = arith.constant 0 : i32
    return %arg0, %c0_i32 : i32, i32
  }
}

</mosaic_0001>

<bundles_post_ra>
// kernel: tpu_custom_call.1
= control target key start
LH: loop header
LB: loop body
LE: loop exit
PB: predicated region body
PF: predicated region fallthrough
CT: control target
= control target key end

     0   :  { %s502_s12 = smov 0   ;;  %s547_s0 = inlined_call_operand.vmem [shape: f32[128,48], index: 0, kind: input, shape index: {}]   ;;  %s548_s1 = inlined_call_operand.vmem [shape: bf16[48,32], index: 1, kind: input, shape index: {}]   ;;  %s549_s2 = inlined_call_operand.vmem [shape: f32[1,32], index: 2, kind: input, shape index: {}]   ;;  %s550_s3 = inlined_call_operand.vmem [shape: bf16[128,32], index: 3, kind: output, shape index: {}]  }
   0x1 LB: > { %s401_s13 = sadd.s32 4294967295, %s480_s12   ;;  %p405_p0 = scmp.ge.s32.totalorder %s480_s12, 1  ;;  %s480_s12 = sphi %s502_s12, %s13_s12  }
   0x2   : > { %p138_p1 = scmp.lt.s32.totalorder %s480_s12, 3 }
   0x4   : > { %p139_p2 = pnand %p405_p0, %p138_p1 }
   0x5   : > { %v471_v0 = vld [vmem:[%s548_s1] sm:$0xff] (!%p139_p2)   ;;  %s406_s16 = sshll.u32 (!%p139_p2), %s401_s13, 3  ;;  %v472_v1 = vld [vmem:[%s548_s1 + $0x8] sm:$0xff] (!%p139_p2)   ;;  %v473_v2 = vld [vmem:[%s548_s1 + $0x10] sm:$0xff] (!%p139_p2)   ;;  %vm218_vm0 = vcmask (!%p139_p2), 392192   ;;  %vm336_vm1 = vcmask (!%p139_p2), 257024  }
   0x6   : > { %142 = sbr.rel (%p139_p2) target bundleno = 243 (0xf3), region = 32  ;;  %p163_p3 = scmp.lt.s32.totalorder (!%p139_p2), %s406_s16, 15  ;;  %443 = vmatprep.subr.bf16.mxu0 (!%p139_p2), %v471_v0  ;;  %457 = vmatprep.subr.bf16.mxu1 (!%p139_p2), %v471_v0  ;;  %v410_v15 = vld [vmem:[%s549_s2] ss:$0 sm:$0xff] (!%p139_p2) }
   0x7   : > { %444 = vmatpush3.bf16.msra.mxu0 (!%p139_p2), %v471_v0  ;;  %460 = vmatpush3.bf16.msra.mxu1 (!%p139_p2), %v471_v0 }
   0x8   : > { %445 = vmatprep.subr.bf16.mxu0 (!%p139_p2), %v472_v1  ;;  %458 = vmatprep.subr.bf16.mxu1 (!%p139_p2), %v472_v1 }
   0xb   : > { %446 = vmatpush3.bf16.msra.mxu0 (!%p139_p2), %v472_v1  ;;  %461 = vmatpush3.bf16.msra.mxu1 (!%p139_p2), %v472_v1 }
   0xc   : > { %447 = vmatprep.subr.bf16.mxu0 (!%p139_p2), %v473_v2  ;;  %459 = vmatprep.subr.bf16.mxu1 (!%p139_p2), %v473_v2 }
   0xd   : > { %s552_s16 = smov (!%p163_p3, %s406_s16), 15 }
   0xe   : > { %s407_s21 = sshll.u32 %s552_s16, 3  ;;  %s409_s27 = sshll.u32 %s552_s16, 2 }
   0xf   : > { %s166_s24 = scalar_lea.vmem %s547_s0, %s407_s21  ;;  %448 = vmatpush3.bf16.msra.mxu0 %v473_v2  ;;  %462 = vmatpush3.bf16.msra.mxu1 %v473_v2  ;;  %s172_s30 = scalar_lea.vmem %s550_s3, %s409_s27 }
  0x10   : > { %v175_v3 = vld [vmem:[%s166_s24] sm:$0xff]  ;;  %v176_v4 = vld [vmem:[%s166_s24 + $0x8] sm:$0xff]  ;;  %v177_v8 = vld [vmem:[%s166_s24 + $0x10] sm:$0xff] }
  0x11   : > { %v179_v5 = vld [vmem:[%s166_s24 + $0x20] sm:$0xff]  ;;  %v183_v6 = vpack.c.bf16 %v176_v4, %v175_v3  ;;  %v180_v7 = vld [vmem:[%s166_s24 + $0x28] sm:$0xff]  ;;  %v178_v9 = vld [vmem:[%s166_s24 + $0x18] sm:$0xff] }
  0x12   : > { %v185_v10 = vpack.c.bf16 %v180_v7, %v179_v5  ;;  %v181_v11 = vld [vmem:[%s166_s24 + $0x30] sm:$0xff]  ;;  %v182_v12 = vld [vmem:[%s166_s24 + $0x38] sm:$0xff]  ;;  %v184_v13 = vpack.c.bf16 %v178_v9, %v177_v8 }
  0x13   : > { %449 = vmatprep.mubr.msk.bf16.mxu0 %vm218_vm0, %v183_v6  ;;  %v186_v14 = vpack.c.bf16 %v182_v12, %v181_v11 }
  0x14   : > { %453 = vmatprep.mubr.msk.bf16.mxu1 %vm218_vm0, %v185_v10  ;;  %450 = vmatmul.mubr.msk.bf16.vlgmr.msra.gmra.mrb[0].mxu0 %vm218_vm0, %v184_v13 }
  0x15   : > { %454 = vmatmul.mubr.msk.bf16.vlgmr.msra.gmra.mrb[0].mxu1 %vm218_vm0, %v186_v14 }
  0xe7   : > { %v451_v16 = vpop.f32.mrb[0].mxu0 }
  0xe8   : > { %v455_v17 = vpop.f32.mrb[0].mxu1  ;;  %v274_v18 = vadd.f32 %v451_v16, %v410_v15  ;;  %v265_v20 = vpop.f32.mrb[1].mxu0 }
  0xe9   : > { %v290_v19 = vadd.f32 %v455_v17, %v410_v15  ;;  %v281_v21 = vpop.f32.mrb[1].mxu1  ;;  %v266_v22 = vadd.f32 %v410_v15, %v265_v20  ;;  %v452_v24 = vpop.f32.mrb[2].mxu0 }
  0xea   : > { %v282_v23 = vadd.f32 %v410_v15, %v281_v21  ;;  %v456_v25 = vpop.f32.mrb[2].mxu1  ;;  %v298_v26 = vmax.f32 %v274_v18, 0.0  ;;  %v277_v28 = vadd.f32 %v452_v24, %v410_v15  ;;  %v268_v30 = vpop.f32.mrb[3].mxu0 }
  0xeb   : > { %v302_v27 = vmax.f32 %v290_v19, 0.0  ;;  %v293_v29 = vadd.f32 %v456_v25, %v410_v15  ;;  %v284_v31 = vpop.f32.mrb[3].mxu1  ;;  %v296_v32 = vmax.f32 %v266_v22, 0.0  ;;  %v269_v34 = vadd.f32 %v410_v15, %v268_v30 }
  0xec   : > { %v300_v33 = vmax.f32 %v282_v23, 0.0  ;;  %v285_v35 = vadd.f32 %v410_v15, %v284_v31  ;;  %v430_v36 = vpack.c.bf16 %v298_v26, %v298_v26  ;;  %v299_v38 = vmax.f32 %v277_v28, 0.0 }
  0xed   : > { %v434_v37 = vpack.c.bf16 %v302_v27, %v302_v27  ;;  %v303_v39 = vmax.f32 %v293_v29, 0.0  ;;  %v428_v40 = vpack.c.bf16 %v296_v32, %v296_v32  ;;  %v297_v42 = vmax.f32 %v269_v34, 0.0 }
  0xee   : > { %v432_v41 = vpack.c.bf16 %v300_v33, %v300_v33  ;;  %v301_v43 = vmax.f32 %v285_v35, 0.0  ;;  %339 = vst.msk [vmem:[%s172_s30 + $0x8] sm:$0xf] %vm336_vm1, %v430_v36  ;;  %v431_v44 = vpack.c.bf16 %v299_v38, %v299_v38 }
  0xef   : > { %343 = vst.msk [vmem:[%s172_s30 + $0x18] sm:$0xf] %vm336_vm1, %v434_v37  ;;  %v435_v45 = vpack.c.bf16 %v303_v39, %v303_v39  ;;  %337 = vst.msk [vmem:[%s172_s30] sm:$0xf] %vm336_vm1, %v428_v40  ;;  %v429_v46 = vpack.c.bf16 %v297_v42, %v297_v42 }
  0xf0   : > { %341 = vst.msk [vmem:[%s172_s30 + $0x10] sm:$0xf] %vm336_vm1, %v432_v41  ;;  %v433_v47 = vpack.c.bf16 %v301_v43, %v301_v43  ;;  %340 = vst.msk [vmem:[%s172_s30 + $0xc] sm:$0xf] %vm336_vm1, %v431_v44 }
  0xf1   : > { %344 = vst.msk [vmem:[%s172_s30 + $0x1c] sm:$0xf] %vm336_vm1, %v435_v45  ;;  %338 = vst.msk [vmem:[%s172_s30 + $0x4] sm:$0xf] %vm336_vm1, %v429_v46 }
  0xf2   : > { %342 = vst.msk [vmem:[%s172_s30 + $0x14] sm:$0xf] %vm336_vm1, %v433_v47 }
  0xf3 PF: > { %s13_s12 = sadd.s32 1, %s480_s12  }
  0xf4   : > { %p10_p4 = scmp.ge.s32.totalorder %s13_s12, 4  }
  0xf6   :  { %12 = sbr.rel (!%p10_p4) target bundleno = 1 (0x1), region = 62 }

</bundles_post_ra>
